<compile_context>
chip_gen: v6e
topology: v6e:2x2x1
jax: 0.10.0
libtpu: 0.0.40
codegen_flags: <defaults>
</compile_context>

<pallas_src>
import jax
import jax.numpy as jnp
from jax.experimental import pallas as pl
from jax.experimental.pallas import tpu as pltpu


def _round_up(x, m):
    return ((x + m - 1) // m) * m


def _vmem_capacity_bytes():
    try:
        info = pltpu.get_tpu_info()
        cap = getattr(info, "vmem_capacity_bytes", None)
        if cap:
            return int(cap)
    except Exception:
        pass
    return 64 * 1024 * 1024  # v7x-safe default


def _make_kernel(tk, hw_resident):
    def kernel(a_ref, hw_ref, b_ref, o_ref, deg_ref):
        k = pl.program_id(1)

        @pl.when(k == 0)
        def _():
            o_ref[...] = jnp.zeros_like(o_ref)
            deg_ref[...] = jnp.zeros_like(deg_ref)

        a = a_ref[...]                                   # bf16 (tm, tk)

        if hw_resident:
            # Whole Hw lives in VMEM; slice the current K window.
            start = pl.multiple_of(k * tk, tk)
            hw = hw_ref[pl.ds(start, tk), :]             # bf16 (tk, fp)
        else:
            hw = hw_ref[...]                             # bf16 (tk, fp)

        # Aggregation on the MXU: bf16 x bf16 -> f32 accumulation directly
        # into the resident output block.
        o_ref[...] += jnp.dot(a, hw, preferred_element_type=jnp.float32)

        # Fused dst in-degree (row sums of A), f32 accumulation on the XLU.
        deg_ref[...] += jnp.sum(a, axis=1, keepdims=True, dtype=jnp.float32)

        @pl.when(k == pl.num_programs(1) - 1)
        def _():
            ddst_inv = jax.lax.rsqrt(jnp.maximum(deg_ref[...], 1.0))
            o_ref[...] = (o_ref[...] * ddst_inv + b_ref[...]).astype(o_ref.dtype)

    return kernel


def sparse_graph_conv(adj, feat, weight, bias, *, tile=512, hw_resident=None):
    """adj: (N,N) with adj[dst,src]=1 per edge; feat: (N,Fin); weight: (Fin,Fout)."""
    N, f_in = feat.shape
    f_out = weight.shape[1]

    fp = _round_up(f_out, 128)          # lane-dense padded output width
    np_ = _round_up(N, 128)
    tm = tk = min(tile, np_)
    np_ = _round_up(np_, tm)

    # Narrow-dtype adjacency first, then pad (no full-size f32 intermediate).
    adj_bf16 = adj.astype(jnp.bfloat16)
    adj_p = jnp.pad(adj_bf16, ((0, np_ - N), (0, np_ - N)))

    # Source normalization D_src^{-1/2}: out-degree = column sums of A
    # (exact: 0/1 entries, f32 accumulation).
    out_deg = jnp.maximum(jnp.sum(adj_bf16, axis=0, dtype=jnp.float32), 1.0)
    dsrc_inv = jax.lax.rsqrt(out_deg)

    # Hoisted projection: Hw = (feat * D_src^{-1/2}) @ W, computed once in XLA,
    # padded to (np_, fp) and stored bf16 for the MXU aggregation.
    hw = jnp.dot(feat.astype(jnp.float32) * dsrc_inv[:, None],
                 weight.astype(jnp.float32),
                 preferred_element_type=jnp.float32)
    hw_p = jnp.pad(hw, ((0, np_ - N), (0, fp - f_out))).astype(jnp.bfloat16)

    b_p = jnp.zeros((1, fp), jnp.float32).at[0, :f_out].set(bias.astype(jnp.float32))

    # Generation-aware VMEM budgeting (64 MiB/TC on v7x, 128 MiB on v5e/v6e).
    vmem_cap = _vmem_capacity_bytes()
    hw_bytes = np_ * fp * 2
    if hw_resident is None:
        # Conservative: assume the resident block may be double-buffered.
        hw_resident = hw_bytes <= vmem_cap // 4

    if hw_resident:
        hw_spec = pl.BlockSpec((np_, fp), lambda i, k: (0, 0))
        hw_vmem = 2 * hw_bytes
    else:
        hw_spec = pl.BlockSpec((tk, fp), lambda i, k: (k, 0))
        hw_vmem = 2 * tk * fp * 2

    need = (2 * tm * tk * 2          # double-buffered A tiles (bf16)
            + hw_vmem                # Hw (resident or double-buffered tile)
            + 2 * tm * fp * 4        # output block (+ writeback buffer)
            + tm * 4                 # degree scratch
            + 2 * fp * 4             # bias block
            + (1 << 20))             # slack
    vmem_limit = int(min(max(need + (8 << 20), 32 << 20), 0.9 * vmem_cap))

    grid = (np_ // tm, np_ // tk)

    out_p = pl.pallas_call(
        _make_kernel(tk, hw_resident),
        out_shape=jax.ShapeDtypeStruct((np_, fp), jnp.float32),
        grid_spec=pltpu.PrefetchScalarGridSpec(
            num_scalar_prefetch=0,
            grid=grid,
            in_specs=[
                pl.BlockSpec((tm, tk), lambda i, k: (i, k)),   # A tile (bf16)
                hw_spec,                                       # Hw (bf16)
                pl.BlockSpec((1, fp), lambda i, k: (0, 0)),    # bias (padded)
            ],
            out_specs=pl.BlockSpec((tm, fp), lambda i, k: (i, 0)),
            scratch_shapes=[
                pltpu.VMEM((tm, 1), jnp.float32),   # dst in-degree accumulator
            ],
        ),
        compiler_params=pltpu.CompilerParams(
            dimension_semantics=("parallel", "arbitrary"),
            vmem_limit_bytes=vmem_limit,
        ),
    )(adj_p, hw_p, b_p)

    return out_p[:N, :f_out]


def init_sparse_graphconv_params(key, in_feats, out_feats, sparsity=0.5):
    """Param init mirroring SparseGraphConv: xavier_uniform weight, zero bias,
    then zero out `sparsity` fraction of flattened weight entries at randomly
    permuted indices (init-time only; the matmul stays dense on the MXU)."""
    k_w, k_perm = jax.random.split(key)
    limit = (6.0 / (in_feats + out_feats)) ** 0.5
    weight = jax.random.uniform(k_w, (in_feats, out_feats),
                                minval=-limit, maxval=limit, dtype=jnp.float32)
    bias = jnp.zeros((out_feats,), dtype=jnp.float32)
    if sparsity > 0:
        numel = in_feats * out_feats
        n_zero = int(sparsity * numel)
        perm = jax.random.permutation(k_perm, numel)
        zero_idx = perm[:n_zero]
        w_flat = weight.reshape(-1)
        w_flat = w_flat.at[zero_idx].set(0.0)
        weight = w_flat.reshape(in_feats, out_feats)
    return weight, bias


if __name__ == "__main__":
    key = jax.random.PRNGKey(0)
    k_adj, k_feat, k_param = jax.random.split(key, 3)

    N = 16          # number of graph nodes
    IN_FEATS = 8
    OUT_FEATS = 4
    SPARSITY = 0.5

    # Random directed graph as a dense adjacency matrix A[dst, src].
    adj = (jax.random.uniform(k_adj, (N, N)) < 0.3).astype(jnp.float32)
    feat = jax.random.normal(k_feat, (N, IN_FEATS), dtype=jnp.float32)

    weight, bias = init_sparse_graphconv_params(k_param, IN_FEATS, OUT_FEATS,
                                                sparsity=SPARSITY)

    # Default path (Hw resident in VMEM at this size).
    out = jax.block_until_ready(sparse_graph_conv(adj, feat, weight, bias))
    # Also exercise the tiled-Hw fallback path so both branches are validated.
    out_tiled = jax.block_until_ready(
        sparse_graph_conv(adj, feat, weight, bias, hw_resident=False))

    # Pure-JAX reference (original DGL ordering; mathematically identical).
    out_deg = jnp.maximum(jnp.sum(adj, axis=0), 1.0)
    in_deg = jnp.maximum(jnp.sum(adj, axis=1), 1.0)
    ref = ((adj @ (feat * (out_deg ** -0.5)[:, None]))
           * (in_deg ** -0.5)[:, None]) @ weight + bias[None, :]

    assert out.shape == (N, OUT_FEATS)
    # bf16 Hw introduces ~1e-3 abs error at these scales; tolerance loosened.
    assert jnp.allclose(out, ref, atol=1e-2, rtol=1e-2)
    assert jnp.allclose(out_tiled, ref, atol=1e-2, rtol=1e-2)

    print("KERNEL_OK")
</pallas_src>

<mosaic_0001>
module attributes {stable_mosaic.version = 11 : i64} {
  func.func @kernel(%arg0: i32, %arg1: i32, %arg2: memref<128x128xbf16, #tpu.memory_space<vmem>>, %arg3: memref<128x128xbf16, #tpu.memory_space<vmem>>, %arg4: memref<1x128xf32, #tpu.memory_space<vmem>>, %arg5: memref<128x128xf32, #tpu.memory_space<vmem>>, %arg6: memref<128x1xf32, #tpu.memory_space<vmem>>) attributes {dimension_semantics = [#tpu.dimension_semantics<parallel>, #tpu.dimension_semantics<arbitrary>], iteration_bounds = array<i64: 1, 1>, scalar_prefetch = 0 : i64, scratch_operands = 1 : i64, tpu.core_type = #tpu.core_type<tc>, window_params = [{transform_indices = @transform_0, window_bounds = array<i64: 128, 128>}, {pipeline_mode = #tpu.pipeline_mode<synchronous>, transform_indices = @transform_1, window_bounds = array<i64: 128, 128>}, {pipeline_mode = #tpu.pipeline_mode<synchronous>, transform_indices = @transform_2, window_bounds = array<i64: 1, 128>}, {transform_indices = @transform_3, window_bounds = array<i64: 128, 128>}]} {
    %c0_i32 = arith.constant 0 : i32
    %0 = arith.cmpi eq, %arg1, %c0_i32 : i32
    %1 = arith.extui %0 : i1 to i32
    %c0_i32_0 = arith.constant 0 : i32
    %2 = arith.cmpi ne, %1, %c0_i32_0 : i32
    scf.if %2 {
      %cst_14 = arith.constant 0.000000e+00 : f32
      %21 = vector.broadcast %cst_14 : f32 to vector<128x128xf32>
      %c0_15 = arith.constant 0 : index
      %c0_16 = arith.constant 0 : index
      %22 = vector.load %arg5[%c0_15, %c0_16] : memref<128x128xf32, #tpu.memory_space<vmem>>, vector<128x128xf32>
      tpu.vector_store %arg5[%c0_15, %c0_16], %21 {strides = array<i32>} : memref<128x128xf32, #tpu.memory_space<vmem>>, vector<128x128xf32>,
      %cst_17 = arith.constant 0.000000e+00 : f32
      %23 = vector.broadcast %cst_17 : f32 to vector<128x1xf32>
      %c0_18 = arith.constant 0 : index
      %c0_19 = arith.constant 0 : index
      %24 = vector.load %arg6[%c0_18, %c0_19] : memref<128x1xf32, #tpu.memory_space<vmem>>, vector<128x1xf32>
      tpu.vector_store %arg6[%c0_18, %c0_19], %23 {strides = array<i32>} : memref<128x1xf32, #tpu.memory_space<vmem>>, vector<128x1xf32>,
    } else {
    }
    %c0 = arith.constant 0 : index
    %c0_1 = arith.constant 0 : index
    %3 = vector.load %arg2[%c0, %c0_1] : memref<128x128xbf16, #tpu.memory_space<vmem>>, vector<128x128xbf16>
    %c128_i32 = arith.constant 128 : i32
    %4 = arith.muli %arg1, %c128_i32 : i32
    %5 = tpu.assume_multiple %4, 128 : i32
    %6 = arith.index_cast %5 : i32 to index
    %c0_2 = arith.constant 0 : index
    %7 = vector.load %arg3[%6, %c0_2] : memref<128x128xbf16, #tpu.memory_space<vmem>>, vector<128x128xbf16>
    %c0_3 = arith.constant 0 : index
    %c0_4 = arith.constant 0 : index
    %8 = vector.load %arg5[%c0_3, %c0_4] : memref<128x128xf32, #tpu.memory_space<vmem>>, vector<128x128xf32>
    %cst = arith.constant dense<0.000000e+00> : vector<128x128xf32>
    %9 = tpu.matmul %3, %7, %cst {dimension_numbers = #tpu.dot_dimension_numbers<[1], [0], [0], [1], [0, 0, 1, 1], [], []>} : vector<128x128xbf16>, vector<128x128xbf16>, vector<128x128xf32> -> vector<128x128xf32>
    %10 = arith.addf %8, %9 : vector<128x128xf32>
    %c0_5 = arith.constant 0 : index
    %c0_6 = arith.constant 0 : index
    %11 = vector.load %arg5[%c0_5, %c0_6] : memref<128x128xf32, #tpu.memory_space<vmem>>, vector<128x128xf32>
    tpu.vector_store %arg5[%c0_5, %c0_6], %10 {strides = array<i32>} : memref<128x128xf32, #tpu.memory_space<vmem>>, vector<128x128xf32>,
    %c0_7 = arith.constant 0 : index
    %c0_8 = arith.constant 0 : index
    %12 = vector.load %arg6[%c0_7, %c0_8] : memref<128x1xf32, #tpu.memory_space<vmem>>, vector<128x1xf32>
    %13 = arith.extf %3 : vector<128x128xbf16> to vector<128x128xf32>
    %cst_9 = arith.constant dense<0.000000e+00> : vector<128xf32>
    %14 = vector.multi_reduction <add>, %13, %cst_9 [1] : vector<128x128xf32> to vector<128xf32>
    %15 = vector.shape_cast %14 : vector<128xf32> to vector<128x1xf32>
    %16 = arith.addf %12, %15 : vector<128x1xf32>
    %c0_10 = arith.constant 0 : index
    %c0_11 = arith.constant 0 : index
    %17 = vector.load %arg6[%c0_10, %c0_11] : memref<128x1xf32, #tpu.memory_space<vmem>>, vector<128x1xf32>
    tpu.vector_store %arg6[%c0_10, %c0_11], %16 {strides = array<i32>} : memref<128x1xf32, #tpu.memory_space<vmem>>, vector<128x1xf32>,
    %c0_i32_12 = arith.constant 0 : i32
    %18 = arith.cmpi eq, %arg1, %c0_i32_12 : i32
    %19 = arith.extui %18 : i1 to i32
    %c0_i32_13 = arith.constant 0 : i32
    %20 = arith.cmpi ne, %19, %c0_i32_13 : i32
    scf.if %20 {
      %c0_14 = arith.constant 0 : index
      %c0_15 = arith.constant 0 : index
      %21 = vector.load %arg6[%c0_14, %c0_15] : memref<128x1xf32, #tpu.memory_space<vmem>>, vector<128x1xf32>
      %cst_16 = arith.constant 1.000000e+00 : f32
      %22 = vector.broadcast %cst_16 : f32 to vector<128x1xf32>
      %23 = arith.maximumf %21, %22 : vector<128x1xf32>
      %24 = math.rsqrt %23 : vector<128x1xf32>
      %c0_17 = arith.constant 0 : index
      %c0_18 = arith.constant 0 : index
      %25 = vector.load %arg5[%c0_17, %c0_18] : memref<128x128xf32, #tpu.memory_space<vmem>>, vector<128x128xf32>
      %26 = vector.broadcast %24 : vector<128x1xf32> to vector<128x128xf32>
      %27 = arith.mulf %25, %26 : vector<128x128xf32>
      %c0_19 = arith.constant 0 : index
      %c0_20 = arith.constant 0 : index
      %28 = vector.load %arg4[%c0_19, %c0_20] : memref<1x128xf32, #tpu.memory_space<vmem>>, vector<1x128xf32>
      %29 = vector.broadcast %28 : vector<1x128xf32> to vector<128x128xf32>
      %30 = arith.addf %27, %29 : vector<128x128xf32>
      %c0_21 = arith.constant 0 : index
      %c0_22 = arith.constant 0 : index
      %31 = vector.load %arg5[%c0_21, %c0_22] : memref<128x128xf32, #tpu.memory_space<vmem>>, vector<128x128xf32>
      tpu.vector_store %arg5[%c0_21, %c0_22], %30 {strides = array<i32>} : memref<128x128xf32, #tpu.memory_space<vmem>>, vector<128x128xf32>,
    } else {
    }
    return
  }
  func.func @transform_0(%arg0: i32, %arg1: i32) -> (i32, i32) {
    %c0_i32 = arith.constant 0 : i32
    return %arg0, %arg1 : i32, i32
  }
  func.func @transform_1(%arg0: i32, %arg1: i32) -> (i32, i32) {
    %c0_i32 = arith.constant 0 : i32
    %c0_i32_0 = arith.constant 0 : i32
    %c0_i32_1 = arith.constant 0 : i32
    return %c0_i32, %c0_i32_0 : i32, i32
  }
  func.func @transform_2(%arg0: i32, %arg1: i32) -> (i32, i32) {
    %c0_i32 = arith.constant 0 : i32
    %c0_i32_0 = arith.constant 0 : i32
    %c0_i32_1 = arith.constant 0 : i32
    return %c0_i32, %c0_i32_0 : i32, i32
  }
  func.func @transform_3(%arg0: i32, %arg1: i32) -> (i32, i32) {
    %c0_i32 = arith.constant 0 : i32
    %c0_i32_0 = arith.constant 0 : i32
    return %arg0, %c0_i32 : i32, i32
  }
}

</mosaic_0001>

<bundles_post_ra>
// kernel: tpu_custom_call.1
= control target key start
LH: loop header
LB: loop body
LE: loop exit
PB: predicated region body
PF: predicated region fallthrough
CT: control target
= control target key end

     0   :  { %8 = vsyncpa [#allocation4], 0  ;;  %s1004_s0 = inlined_call_operand.hbm [shape: bf16[128,128], index: 0, kind: input, shape index: {}]   ;;  %s1005_s1 = inlined_call_operand.hbm [shape: bf16[128,128], index: 1, kind: input, shape index: {}]   ;;  %s1006_s2 = inlined_call_operand.vmem [shape: f32[1,128], index: 2, kind: input, shape index: {}]   ;;  %s1007_s3 = inlined_call_operand.hbm [shape: f32[128,128], index: 3, kind: output, shape index: {}]  }
   0x1   :  { %9 = vsyncpa [#allocation7], 0 }
   0x2   :  { %10 = vsyncpa [#allocation5], 0  ;;  %s892_s12 = smov [#allocation3]  }
   0x3   :  { %s16_s13 = sshll.u32 %s892_s12, 4  ;;  %s17_s13 = int_to_ptr.vmem [resolvable:$true] %s16_s13 }
   0x4   :  { %s834_s14 = scalar_lea.vmem %s17_s13, 1024  ;;  %p839_p1 = scmp.lt.s32.totalorder %s17_s13, %s17_s13 }
   0x5   :  { %p835_p0 = scmp.ne.s32.totalorder %s17_s13, %s834_s14  ;;  %p840_p2 = scmp.lt.s32.totalorder %s834_s14, %s834_s14 }
   0x7   :  { %p841_p3 = por %p840_p2, %p839_p1 }
   0x9   :  { %p842_p4 = pnand %p841_p3, %p835_p0 }
   0xb   :  { %845 = shalt.err (!%p842_p4)
}
   0xc   :  { %s893_s15 = smov 64   ;;  %s894_s16 = smov 4  }
   0xd   :  { %22 = dma.hbm_to_vmem [thread:$0]  %s1004_s0, 1024, %s17_s13, [#allocation4], %s893_s15, %s893_s15, %s894_s16  }
   0xe   :  { %s895_s19 = smov [#allocation6]  }
   0xf   :  { %s28_s20 = sshll.u32 %s895_s19, 4  ;;  %s29_s20 = int_to_ptr.vmem [resolvable:$true] %s28_s20 }
  0x10   :  { %s854_s21 = scalar_lea.vmem %s29_s20, 1024  ;;  %p859_p6 = scmp.lt.s32.totalorder %s29_s20, %s29_s20 }
  0x11   :  { %p855_p5 = scmp.ne.s32.totalorder %s29_s20, %s854_s21  ;;  %p860_p7 = scmp.lt.s32.totalorder %s854_s21, %s854_s21 }
  0x13   :  { %p861_p8 = por %p860_p7, %p859_p6 }
  0x15   :  { %p862_p9 = pnand %p861_p8, %p855_p5 }
  0x17   :  { %865 = shalt.err (!%p862_p9)
}
  0x18   :  { %34 = dma.hbm_to_vmem [thread:$0]  %s1005_s1, 1024, %s29_s20, [#allocation7], %s893_s15, %s893_s15, %s894_s16  }
  0x19   :  { %886 = dma.done.wait [#allocation4], 1024  }
  0x1a   :  { %887 = vsyncadd [#allocation4], 4294966272 }
  0x1b   :  { %888 = dma.done.wait [#allocation7], 1024  }
  0x1c   :  { %889 = vsyncadd [#allocation7], 4294966272  ;;  %vm64_vm0 = vcmask 7168   ;;  %v896_v0 = vmov 0.0   ;;  %v943_v1 = vld [vmem:[#allocation3 + $0x8] sm:$0xff]   ;;  %v81_v2 = vld [vmem:[#allocation3] sm:$0xff]  }
  0x1d   :  { %67 = vst.msk [vmem:[#allocation2 + $0x10] sm:$0xff] %vm64_vm0, %v896_v0  ;;  %65 = vst.msk [vmem:[#allocation2] sm:$0xff] %vm64_vm0, %v896_v0  ;;  %v377_v3 = vunpack.c.l.bf16 %v943_v1  ;;  %v375_v4 = vunpack.c.l.bf16 %v81_v2  ;;  %v946_v5 = vld [vmem:[#allocation3 + $0x10] sm:$0xff]   ;;  %v378_v6 = vunpack.c.h.bf16 %v943_v1  ;;  %v376_v7 = vunpack.c.h.bf16 %v81_v2  ;;  %v776_v8 = vld [vmem:[#allocation6 + $0x38] sm:$0xff]   ;;  %727 = vmatprep.mubr.bf16.mxu0 %v81_v2 }
  0x1e   :  { %66 = vst.msk [vmem:[#allocation2 + $0x8] sm:$0xff] %vm64_vm0, %v896_v0  ;;  %68 = vst.msk [vmem:[#allocation2 + $0x18] sm:$0xff] %vm64_vm0, %v896_v0  ;;  %v777_v9 = vld [vmem:[#allocation6 + $0x30] sm:$0xff]   ;;  %v90_v10 = vld [vmem:[#allocation3 + $0x20] sm:$0xff]   ;;  %711 = vmatprep.subr.bf16.mxu0 %v776_v8  ;;  %743 = vmatprep.subr.bf16.mxu1 %v776_v8  ;;  %v380_v11 = vunpack.c.h.bf16 %v946_v5  ;;  %v379_v13 = vunpack.c.l.bf16 %v946_v5  ;;  %v897_v33 = vmov 0  }
  0x1f   :  { %69 = vst.msk [vmem:[#allocation2 + $0x20] sm:$0xff] %vm64_vm0, %v896_v0  ;;  %70 = vst.msk [vmem:[#allocation2 + $0x28] sm:$0xff] %vm64_vm0, %v896_v0  ;;  %395 = vadd.xlane.f32.xlu1 %v377_v3  ;;  %391 = vadd.xlane.f32.xlu0 %v375_v4  ;;  %v950_v12 = vld [vmem:[#allocation3 + $0x18] sm:$0xff]   ;;  %v778_v14 = vld [vmem:[#allocation6 + $0x28] sm:$0xff]   ;;  %v384_v18 = vunpack.c.h.bf16 %v90_v10  ;;  %v383_v19 = vunpack.c.l.bf16 %v90_v10 }
  0x20   :  { %71 = vst.msk [vmem:[#allocation2 + $0x30] sm:$0xff] %vm64_vm0, %v896_v0  ;;  %72 = vst.msk [vmem:[#allocation2 + $0x38] sm:$0xff] %vm64_vm0, %v896_v0  ;;  %712 = vmatpush3.bf16.msra.mxu0 %v776_v8  ;;  %751 = vmatpush3.bf16.msra.mxu1 %v776_v8  ;;  %v382_v15 = vunpack.c.h.bf16 %v950_v12  ;;  %v381_v16 = vunpack.c.l.bf16 %v950_v12  ;;  %v779_v17 = vld [vmem:[#allocation6 + $0x20] sm:$0xff]   ;;  %v92_v20 = vld [vmem:[#allocation3 + $0x28] sm:$0xff]  }
  0x21   :  { %73 = vst.msk [vmem:[#allocation2 + $0x40] sm:$0xff] %vm64_vm0, %v896_v0  ;;  %74 = vst.msk [vmem:[#allocation2 + $0x48] sm:$0xff] %vm64_vm0, %v896_v0  ;;  %713 = vmatprep.subr.bf16.mxu0 %v777_v9  ;;  %744 = vmatprep.subr.bf16.mxu1 %v777_v9  ;;  %v780_v21 = vld [vmem:[#allocation6 + $0x18] sm:$0xff]   ;;  %v386_v22 = vunpack.c.h.bf16 %v92_v20  ;;  %v385_v23 = vunpack.c.l.bf16 %v92_v20  ;;  %v94_v24 = vld [vmem:[#allocation3 + $0x30] sm:$0xff]  }
  0x22   :  { %75 = vst.msk [vmem:[#allocation2 + $0x50] sm:$0xff] %vm64_vm0, %v896_v0  ;;  %76 = vst.msk [vmem:[#allocation2 + $0x58] sm:$0xff] %vm64_vm0, %v896_v0  ;;  %735 = vmatprep.mubr.bf16.mxu1 %v90_v10  ;;  %v781_v25 = vld [vmem:[#allocation6 + $0x10] sm:$0xff]   ;;  %v388_v26 = vunpack.c.h.bf16 %v94_v24  ;;  %v387_v27 = vunpack.c.l.bf16 %v94_v24  ;;  %v96_v28 = vld [vmem:[#allocation3 + $0x38] sm:$0xff]   ;;  %768 = vset.pattern.permute.xlu0 %v897_v33 }
  0x23   :  { %77 = vst.msk [vmem:[#allocation2 + $0x60] sm:$0xff] %vm64_vm0, %v896_v0  ;;  %78 = vst.msk [vmem:[#allocation2 + $0x68] sm:$0xff] %vm64_vm0, %v896_v0  ;;  %397 = vadd.xlane.f32.xlu1 %v378_v6  ;;  %393 = vadd.xlane.f32.xlu0 %v376_v7  ;;  %v782_v29 = vld [vmem:[#allocation6 + $0x8] sm:$0xff]   ;;  %v390_v30 = vunpack.c.h.bf16 %v96_v28  ;;  %v389_v31 = vunpack.c.l.bf16 %v96_v28  ;;  %v783_v32 = vld [vmem:[#allocation6] sm:$0xff]  }
  0x24   :  { %79 = vst.msk [vmem:[#allocation2 + $0x70] sm:$0xff] %vm64_vm0, %v896_v0  ;;  %80 = vst.msk [vmem:[#allocation2 + $0x78] sm:$0xff] %vm64_vm0, %v896_v0  ;;  %714 = vmatpush3.bf16.msra.mxu0 %v777_v9  ;;  %752 = vmatpush3.bf16.msra.mxu1 %v777_v9  ;;  %v361_v34 = vld [vmem:[#allocation2 + $0x10] sm:$0xff]  ;;  %v359_v35 = vld [vmem:[#allocation2] sm:$0xff] }
  0x25   :  { %715 = vmatprep.subr.bf16.mxu0 %v778_v14  ;;  %745 = vmatprep.subr.bf16.mxu1 %v778_v14  ;;  %v362_v40 = vld [vmem:[#allocation2 + $0x18] sm:$0xff]  ;;  %v360_v41 = vld [vmem:[#allocation2 + $0x8] sm:$0xff] }
  0x26   :  { %769 = vset.pattern.permute.xlu1 %v897_v33  ;;  %v364_v46 = vld [vmem:[#allocation2 + $0x28] sm:$0xff]  ;;  %v363_v47 = vld [vmem:[#allocation2 + $0x20] sm:$0xff] }
  0x27   :  { %401 = vadd.xlane.f32.xlu1 %v380_v11  ;;  %399 = vadd.xlane.f32.xlu0 %v379_v13  ;;  %v366_v52 = vld [vmem:[#allocation2 + $0x38] sm:$0xff]  ;;  %v365_v53 = vld [vmem:[#allocation2 + $0x30] sm:$0xff] }
  0x28   :  { %716 = vmatpush3.bf16.msra.mxu0 %v778_v14  ;;  %753 = vmatpush3.bf16.msra.mxu1 %v778_v14  ;;  %v368_v61 = vld [vmem:[#allocation2 + $0x48] sm:$0xff]  ;;  %v367_v63 = vld [vmem:[#allocation2 + $0x40] sm:$0xff] }
  0x29   :  { %717 = vmatprep.subr.bf16.mxu0 %v779_v17  ;;  %746 = vmatprep.subr.bf16.mxu1 %v779_v17  ;;  %v370_v7 = vld [vmem:[#allocation2 + $0x58] sm:$0xff]  ;;  %v369_v8 = vld [vmem:[#allocation2 + $0x50] sm:$0xff] }
  0x2b   :  { %405 = vadd.xlane.f32.xlu1 %v382_v15  ;;  %403 = vadd.xlane.f32.xlu0 %v381_v16  ;;  %v372_v15 = vld [vmem:[#allocation2 + $0x68] sm:$0xff]  ;;  %v371_v16 = vld [vmem:[#allocation2 + $0x60] sm:$0xff] }
  0x2c   :  { %718 = vmatpush3.bf16.msra.mxu0 %v779_v17  ;;  %754 = vmatpush3.bf16.msra.mxu1 %v779_v17 }
  0x2d   :  { %719 = vmatprep.subr.bf16.mxu0 %v780_v21  ;;  %747 = vmatprep.subr.bf16.mxu1 %v780_v21 }
  0x2f   :  { %409 = vadd.xlane.f32.xlu1 %v384_v18  ;;  %407 = vadd.xlane.f32.xlu0 %v383_v19 }
  0x30   :  { %720 = vmatpush3.bf16.msra.mxu0 %v780_v21  ;;  %755 = vmatpush3.bf16.msra.mxu1 %v780_v21 }
  0x31   :  { %721 = vmatprep.subr.bf16.mxu0 %v781_v25  ;;  %748 = vmatprep.subr.bf16.mxu1 %v781_v25 }
  0x33   :  { %413 = vadd.xlane.f32.xlu1 %v386_v22  ;;  %411 = vadd.xlane.f32.xlu0 %v385_v23 }
  0x34   :  { %722 = vmatpush3.bf16.msra.mxu0 %v781_v25  ;;  %756 = vmatpush3.bf16.msra.mxu1 %v781_v25 }
  0x35   :  { %723 = vmatprep.subr.bf16.mxu0 %v782_v29  ;;  %749 = vmatprep.subr.bf16.mxu1 %v782_v29 }
  0x37   :  { %417 = vadd.xlane.f32.xlu1 %v388_v26  ;;  %415 = vadd.xlane.f32.xlu0 %v387_v27  ;;  %v373_v26 = vld [vmem:[#allocation2 + $0x70] sm:$0xff] }
  0x38   :  { %724 = vmatpush3.bf16.msra.mxu0 %v782_v29  ;;  %757 = vmatpush3.bf16.msra.mxu1 %v782_v29 }
  0x39   :  { %725 = vmatprep.subr.bf16.mxu0 %v783_v32  ;;  %750 = vmatprep.subr.bf16.mxu1 %v783_v32 }
  0x3b   :  { %421 = vadd.xlane.f32.xlu1 %v390_v30  ;;  %419 = vadd.xlane.f32.xlu0 %v389_v31 }
  0x3c   :  { %726 = vmatpush3.bf16.msra.mxu0 %v783_v32  ;;  %758 = vmatpush3.bf16.msra.mxu1 %v783_v32 }
  0x3f   :  { %728 = vmatmul.mubr.bf16.vlgmr.msra.gmra.mxu0 %v943_v1  ;;  %736 = vmatmul.mubr.bf16.vlgmr.msra.gmra.mxu1 %v92_v20 }
  0x40   :  { %731 = vmatprep.mubr.bf16.mxu0 %v946_v5  ;;  %739 = vmatprep.mubr.bf16.mxu1 %v94_v24  ;;  %v374_v24 = vld [vmem:[#allocation2 + $0x78] sm:$0xff] }
  0x47   :  { %732 = vmatmul.mubr.bf16.gmra.mxu0 %v950_v12  ;;  %740 = vmatmul.mubr.bf16.gmra.mxu1 %v96_v28 }
  0xa8   :  { %v396_v36 = vpop.xlane.xlu1 %395  ;;  %v392_v37 = vpop.xlane.xlu0 %391 }
  0xa9   :  { %v425_v38 = vadd.f32 %v396_v36, %v361_v34  ;;  %v423_v39 = vadd.f32 %v392_v37, %v359_v35 }
  0xab   :  { %442 = vst.msk [vmem:[#allocation2 + $0x10] sm:$0xff] %vm64_vm0, %v425_v38  ;;  %440 = vst.msk [vmem:[#allocation2] sm:$0xff] %vm64_vm0, %v423_v39 }
  0xac   :  { %v398_v42 = vpop.xlane.xlu1 %397  ;;  %v394_v43 = vpop.xlane.xlu0 %393 }
  0xad   :  { %v426_v44 = vadd.f32 %v398_v42, %v362_v40  ;;  %v424_v45 = vadd.f32 %v394_v43, %v360_v41 }
  0xaf   :  { %443 = vst.msk [vmem:[#allocation2 + $0x18] sm:$0xff] %vm64_vm0, %v426_v44  ;;  %441 = vst.msk [vmem:[#allocation2 + $0x8] sm:$0xff] %vm64_vm0, %v424_v45 }
  0xb0   :  { %v402_v48 = vpop.xlane.xlu1 %401  ;;  %v400_v49 = vpop.xlane.xlu0 %399 }
  0xb1   :  { %v428_v50 = vadd.f32 %v402_v48, %v364_v46  ;;  %v427_v51 = vadd.f32 %v400_v49, %v363_v47 }
  0xb2   :  { %v459_v54 = vld [vmem:[#allocation2] sm:$0xff]  ;;  %v461_v58 = vld [vmem:[#allocation2 + $0x10] sm:$0xff] }
  0xb3   :  { %445 = vst.msk [vmem:[#allocation2 + $0x28] sm:$0xff] %vm64_vm0, %v428_v50  ;;  %444 = vst.msk [vmem:[#allocation2 + $0x20] sm:$0xff] %vm64_vm0, %v427_v51  ;;  %v475_v55 = vmax.f32 %v459_v54, 1.0  ;;  %v477_v1 = vmax.f32 %v461_v58, 1.0 }
  0xb4   :  { %v406_v56 = vpop.xlane.xlu1 %405  ;;  %v404_v57 = vpop.xlane.xlu0 %403 }
  0xb5   :  { %v430_v59 = vadd.f32 %v406_v56, %v366_v52  ;;  %v429_v60 = vadd.f32 %v404_v57, %v365_v53  ;;  %794 = vrsqrt.f32 %v475_v55 }
  0xb6   :  { %v460_v62 = vld [vmem:[#allocation2 + $0x8] sm:$0xff]  ;;  %v462_v4 = vld [vmem:[#allocation2 + $0x18] sm:$0xff] }
  0xb7   :  { %447 = vst.msk [vmem:[#allocation2 + $0x38] sm:$0xff] %vm64_vm0, %v430_v59  ;;  %446 = vst.msk [vmem:[#allocation2 + $0x30] sm:$0xff] %vm64_vm0, %v429_v60  ;;  %v476_v0 = vmax.f32 %v460_v62, 1.0  ;;  %v478_v9 = vmax.f32 %v462_v4, 1.0 }
  0xb8   :  { %v410_v2 = vpop.xlane.xlu1 %409  ;;  %v408_v3 = vpop.xlane.xlu0 %407 }
  0xb9   :  { %v432_v5 = vadd.f32 %v410_v2, %v368_v61  ;;  %796 = vrsqrt.f32 %v476_v0  ;;  %v431_v6 = vadd.f32 %v408_v3, %v367_v63 }
  0xba   :  { %798 = vrsqrt.f32 %v477_v1  ;;  %v463_v12 = vld [vmem:[#allocation2 + $0x20] sm:$0xff]  ;;  %v464_v20 = vld [vmem:[#allocation2 + $0x28] sm:$0xff] }
  0xbb   :  { %449 = vst.msk [vmem:[#allocation2 + $0x48] sm:$0xff] %vm64_vm0, %v432_v5  ;;  %448 = vst.msk [vmem:[#allocation2 + $0x40] sm:$0xff] %vm64_vm0, %v431_v6  ;;  %800 = vrsqrt.f32 %v478_v9  ;;  %v479_v17 = vmax.f32 %v463_v12, 1.0  ;;  %v480_v28 = vmax.f32 %v464_v20, 1.0  ;;  %v979_v9 = vld [vmem:[%s1006_s2] ss:$0 sm:$0xff] }
  0xbc   :  { %v414_v10 = vpop.xlane.xlu1 %413  ;;  %v412_v11 = vpop.xlane.xlu0 %411  ;;  %s898_s2 = smov [#allocation8]  }
  0xbd   :  { %v434_v13 = vadd.f32 %v414_v10, %v370_v7  ;;  %v433_v14 = vadd.f32 %v412_v11, %v369_v8  ;;  %802 = vrsqrt.f32 %v479_v17  ;;  %s663_s24 = sshll.u32 %s898_s2, 4  ;;  %s664_s24 = int_to_ptr.vmem [resolvable:$true] %s663_s24 }
  0xbe   :  { %v465_v31 = vld [vmem:[#allocation2 + $0x30] sm:$0xff]  ;;  %v466_v39 = vld [vmem:[#allocation2 + $0x38] sm:$0xff]  ;;  %s866_s25 = scalar_lea.vmem %s664_s24, 2048  ;;  %p871_p11 = scmp.lt.s32.totalorder %s664_s24, %s664_s24 }
  0xbf   :  { %451 = vst.msk [vmem:[#allocation2 + $0x58] sm:$0xff] %vm64_vm0, %v434_v13  ;;  %450 = vst.msk [vmem:[#allocation2 + $0x50] sm:$0xff] %vm64_vm0, %v433_v14  ;;  %v481_v37 = vmax.f32 %v465_v31, 1.0  ;;  %v482_v42 = vmax.f32 %v466_v39, 1.0  ;;  %p867_p10 = scmp.ne.s32.totalorder %s664_s24, %s866_s25  ;;  %p872_p12 = scmp.lt.s32.totalorder %s866_s25, %s866_s25 }
  0xc0   :  { %v418_v18 = vpop.xlane.xlu1 %417  ;;  %v416_v19 = vpop.xlane.xlu0 %415 }
  0xc1   :  { %v436_v21 = vadd.f32 %v418_v18, %v372_v15  ;;  %v435_v22 = vadd.f32 %v416_v19, %v371_v16  ;;  %p873_p13 = por %p872_p12, %p871_p11 }
  0xc2   :  { %v795_v23 = vpop.eup %794  ;;  %v468_v25 = vld [vmem:[#allocation2 + $0x48] sm:$0xff]  ;;  %v467_v44 = vld [vmem:[#allocation2 + $0x40] sm:$0xff] }
  0xc3   :  { %453 = vst.msk [vmem:[#allocation2 + $0x68] sm:$0xff] %vm64_vm0, %v436_v21  ;;  %525 = vperm.xlu0 %768, %v795_v23   ;;  %452 = vst.msk [vmem:[#allocation2 + $0x60] sm:$0xff] %vm64_vm0, %v435_v22  ;;  %v484_v27 = vmax.f32 %v468_v25, 1.0  ;;  %v483_v47 = vmax.f32 %v467_v44, 1.0  ;;  %p874_p0 = pnand %p873_p13, %p867_p10 }
  0xc4   :  { %v422_v29 = vpop.xlane.xlu1 %421  ;;  %v420_v30 = vpop.xlane.xlu0 %419 }
  0xc5   :  { %v438_v32 = vadd.f32 %v422_v29, %v374_v24  ;;  %804 = vrsqrt.f32 %v484_v27  ;;  %v437_v33 = vadd.f32 %v420_v30, %v373_v26 }
  0xc6   :  { %v797_v34 = vpop.eup %796  ;;  %v470_v35 = vld [vmem:[#allocation2 + $0x58] sm:$0xff]  ;;  %806 = vrsqrt.f32 %v480_v28  ;;  %v469_v49 = vld [vmem:[#allocation2 + $0x50] sm:$0xff] }
  0xc7   :  { %455 = vst.msk [vmem:[#allocation2 + $0x78] sm:$0xff] %vm64_vm0, %v438_v32  ;;  %530 = vperm.xlu1 %769, %v797_v34   ;;  %454 = vst.msk [vmem:[#allocation2 + $0x70] sm:$0xff] %vm64_vm0, %v437_v33  ;;  %v486_v36 = vmax.f32 %v470_v35, 1.0  ;;  %v799_v38 = vpop.eup %798  ;;  %v485_v51 = vmax.f32 %v469_v49, 1.0 }
  0xc8   :  { %v801_v43 = vpop.eup %800 }
  0xc9   :  { %808 = vrsqrt.f32 %v486_v36 }
  0xca   :  { %v472_v40 = vld [vmem:[#allocation2 + $0x68] sm:$0xff]  ;;  %810 = vrsqrt.f32 %v481_v37  ;;  %v803_v48 = vpop.eup %802  ;;  %v471_v53 = vld [vmem:[#allocation2 + $0x60] sm:$0xff] }
  0xcb   :  { %535 = vperm.xlu1 %769, %v799_v38   ;;  %v488_v41 = vmax.f32 %v472_v40, 1.0  ;;  %v487_v55 = vmax.f32 %v471_v53, 1.0 }
  0xcd   :  { %812 = vrsqrt.f32 %v488_v41 }
  0xce   :  { %v474_v45 = vld [vmem:[#allocation2 + $0x78] sm:$0xff]  ;;  %814 = vrsqrt.f32 %v482_v42  ;;  %v473_v57 = vld [vmem:[#allocation2 + $0x70] sm:$0xff] }
  0xcf   :  { %540 = vperm.xlu1 %769, %v801_v43   ;;  %v490_v46 = vmax.f32 %v474_v45, 1.0  ;;  %v489_v59 = vmax.f32 %v473_v57, 1.0 }
  0xd1   :  { %816 = vrsqrt.f32 %v490_v46 }
  0xd2   :  { %v805_v50 = vpop.eup %804  ;;  %818 = vrsqrt.f32 %v483_v47 }
  0xd3   :  { %545 = vperm.xlu1 %769, %v803_v48   ;;  %570 = vperm.xlu0 %768, %v805_v50   ;;  %v807_v52 = vpop.eup %806  ;;  %820 = vrsqrt.f32 %v485_v51 }
  0xd4   :  { %822 = vrsqrt.f32 %v487_v55 }
  0xd5   :  { %824 = vrsqrt.f32 %v489_v59 }
  0xd6   :  { %v809_v54 = vpop.eup %808 }
  0xd7   :  { %550 = vperm.xlu1 %769, %v807_v52   ;;  %580 = vperm.xlu0 %768, %v809_v54   ;;  %v811_v56 = vpop.eup %810 }
  0xda   :  { %v813_v58 = vpop.eup %812 }
  0xdb   :  { %555 = vperm.xlu1 %769, %v811_v56   ;;  %590 = vperm.xlu0 %768, %v813_v58   ;;  %v815_v60 = vpop.eup %814 }
  0xde   :  { %v817_v61 = vpop.eup %816 }
  0xdf   :  { %560 = vperm.xlu1 %769, %v815_v60   ;;  %600 = vperm.xlu0 %768, %v817_v61   ;;  %v819_v62 = vpop.eup %818 }
  0xe0   :  { %v821_v63 = vpop.eup %820 }
  0xe1   :  { %v823_v0 = vpop.eup %822 }
  0xe2   :  { %v825_v1 = vpop.eup %824 }
  0xe3   :  { %565 = vperm.xlu1 %769, %v819_v62  }
  0xe7   :  { %575 = vperm.xlu1 %769, %v821_v63  }
  0xeb   :  { %585 = vperm.xlu1 %769, %v823_v0  }
  0xef   :  { %595 = vperm.xlu1 %769, %v825_v1  }
  0xff   :  { %v729_v2 = vpop.f32.mrf.mxu0  ;;  %v974_v4 = vpop.f32.mrf.mxu1 }
 0x101   :  { %v264_v3 = vpop.f32.mrf.mxu0  ;;  %v296_v6 = vpop.f32.mrf.mxu1 }
 0x103   :  { %v730_v5 = vpop.f32.mrf.mxu0  ;;  %v738_v8 = vpop.f32.mrf.mxu1 }
 0x105   :  { %v267_v7 = vpop.f32.mrf.mxu0  ;;  %v299_v13 = vpop.f32.mrf.mxu1 }
 0x107   :  { %v733_v12 = vpop.f32.mrf.mxu0  ;;  %v982_v18 = vpop.f32.mrf.mxu1 }
 0x109   :  { %v280_v17 = vpop.f32.mrf.mxu0  ;;  %v312_v23 = vpop.f32.mrf.mxu1 }
 0x10b   :  { %v734_v22 = vpop.f32.mrf.mxu0  ;;  %v742_v28 = vpop.f32.mrf.mxu1 }
 0x10d   :  { %v283_v27 = vpop.f32.mrf.mxu0  ;;  %v315_v34 = vpop.f32.mrf.mxu1 }
 0x13e   :  { %v526_v10 = vpop.permute.xlu0 %525 }
 0x13f   :  { %v603_v11 = vmul.f32 %v526_v10, %v264_v3 }
 0x141   :  { %v626_v14 = vadd.f32 %v979_v9, %v603_v11 }
 0x142   :  { %v531_v15 = vpop.permute.xlu1 %530 }
 0x143   :  { %642 = vst [vmem:[#allocation8] sm:$0xff] %v626_v14  ;;  %v604_v16 = vmul.f32 %v531_v15, %v267_v7 }
 0x145   :  { %v627_v19 = vadd.f32 %v979_v9, %v604_v16 }
 0x146   :  { %v536_v20 = vpop.permute.xlu1 %535 }
 0x147   :  { %643 = vst [vmem:[#allocation8 + $0x8] sm:$0xff] %v627_v19  ;;  %v605_v21 = vmul.f32 %v729_v2, %v536_v20 }
 0x149   :  { %v628_v24 = vadd.f32 %v979_v9, %v605_v21 }
 0x14a   :  { %v541_v25 = vpop.permute.xlu1 %540 }
 0x14b   :  { %644 = vst [vmem:[#allocation8 + $0x10] sm:$0xff] %v628_v24  ;;  %v606_v26 = vmul.f32 %v730_v5, %v541_v25 }
 0x14d   :  { %v629_v29 = vadd.f32 %v979_v9, %v606_v26 }
 0x14e   :  { %v546_v30 = vpop.permute.xlu1 %545  ;;  %v571_v31 = vpop.permute.xlu0 %570 }
 0x14f   :  { %645 = vst [vmem:[#allocation8 + $0x18] sm:$0xff] %v629_v29  ;;  %v607_v32 = vmul.f32 %v546_v30, %v280_v17  ;;  %v612_v33 = vmul.f32 %v571_v31, %v299_v13 }
 0x151   :  { %v630_v35 = vadd.f32 %v979_v9, %v607_v32  ;;  %v635_v36 = vadd.f32 %v979_v9, %v612_v33 }
 0x152   :  { %v551_v37 = vpop.permute.xlu1 %550  ;;  %v581_v38 = vpop.permute.xlu0 %580 }
 0x153   :  { %646 = vst [vmem:[#allocation8 + $0x20] sm:$0xff] %v630_v35  ;;  %651 = vst [vmem:[#allocation8 + $0x48] sm:$0xff] %v635_v36  ;;  %v608_v39 = vmul.f32 %v551_v37, %v283_v27  ;;  %v614_v40 = vmul.f32 %v738_v8, %v581_v38 }
 0x155   :  { %v631_v41 = vadd.f32 %v979_v9, %v608_v39  ;;  %v637_v42 = vadd.f32 %v979_v9, %v614_v40 }
 0x156   :  { %v556_v43 = vpop.permute.xlu1 %555  ;;  %v591_v44 = vpop.permute.xlu0 %590 }
 0x157   :  { %647 = vst [vmem:[#allocation8 + $0x28] sm:$0xff] %v631_v41  ;;  %653 = vst [vmem:[#allocation8 + $0x58] sm:$0xff] %v637_v42  ;;  %v609_v45 = vmul.f32 %v733_v12, %v556_v43  ;;  %v616_v46 = vmul.f32 %v591_v44, %v315_v34 }
 0x159   :  { %v632_v47 = vadd.f32 %v979_v9, %v609_v45  ;;  %v639_v48 = vadd.f32 %v979_v9, %v616_v46 }
 0x15a   :  { %v561_v49 = vpop.permute.xlu1 %560  ;;  %v601_v50 = vpop.permute.xlu0 %600 }
 0x15b   :  { %648 = vst [vmem:[#allocation8 + $0x30] sm:$0xff] %v632_v47  ;;  %655 = vst [vmem:[#allocation8 + $0x68] sm:$0xff] %v639_v48  ;;  %v610_v51 = vmul.f32 %v734_v22, %v561_v49  ;;  %v618_v52 = vmul.f32 %v742_v28, %v601_v50 }
 0x15d   :  { %v633_v53 = vadd.f32 %v979_v9, %v610_v51  ;;  %v641_v54 = vadd.f32 %v979_v9, %v618_v52 }
 0x15e   :  { %v566_v55 = vpop.permute.xlu1 %565 }
 0x15f   :  { %649 = vst [vmem:[#allocation8 + $0x38] sm:$0xff] %v633_v53  ;;  %657 = vst [vmem:[#allocation8 + $0x78] sm:$0xff] %v641_v54  ;;  %v611_v56 = vmul.f32 %v566_v55, %v296_v6 }
 0x161   :  { %v634_v57 = vadd.f32 %v979_v9, %v611_v56 }
 0x162   :  { %v576_v58 = vpop.permute.xlu1 %575 }
 0x163   :  { %650 = vst [vmem:[#allocation8 + $0x40] sm:$0xff] %v634_v57  ;;  %v613_v59 = vmul.f32 %v974_v4, %v576_v58 }
 0x165   :  { %v636_v60 = vadd.f32 %v979_v9, %v613_v59 }
 0x166   :  { %v586_v61 = vpop.permute.xlu1 %585 }
 0x167   :  { %652 = vst [vmem:[#allocation8 + $0x50] sm:$0xff] %v636_v60  ;;  %v615_v62 = vmul.f32 %v586_v61, %v312_v23 }
 0x169   :  { %v638_v63 = vadd.f32 %v979_v9, %v615_v62 }
 0x16a   :  { %v596_v0 = vpop.permute.xlu1 %595 }
 0x16b   :  { %654 = vst [vmem:[#allocation8 + $0x60] sm:$0xff] %v638_v63  ;;  %v617_v1 = vmul.f32 %v982_v18, %v596_v0 }
 0x16d   :  { %v640_v2 = vadd.f32 %v979_v9, %v617_v1 }
 0x16f   :  { %656 = vst [vmem:[#allocation8 + $0x70] sm:$0xff] %v640_v2 }
 0x170   :  { %877 = shalt.err (!%p874_p0)
}
 0x171   :  { %s899_s26 = smov 128   ;;  %s900_s27 = smov 8  }
 0x172   :  { %669 = dma.vmem_to_hbm [thread:$0]  %s664_s24, 2048, %s1007_s3, [#allocation5], %s899_s26, %s899_s26, %s900_s27  }
 0x173   :  { %890 = dma.done.wait [#allocation5], 2048  }
 0x174   :  { %891 = vsyncadd [#allocation5], 4294965248 }
 0x175   :  { %673 = vsyncpa [#allocation4], 1 }
 0x176   :  { %674 = vsyncpa [#allocation7], 1 }
 0x177   :  { %675 = vsyncpa [#allocation5], 1 }

</bundles_post_ra>
